<compile_context>
chip_gen: v6e
topology: v6e:2x2x1
jax: 0.10.0
libtpu: 0.0.40
codegen_flags: <defaults>
</compile_context>

<pallas_src>
from functools import partial

import jax
import jax.numpy as jnp
from jax.experimental import pallas as pl
from jax.experimental.pallas import tpu as pltpu


def _linear_kernel(x_ref, w_ref, b_ref, o_ref):
    # MXU matmul (bf16 x bf16 -> f32 accumulate) + bias broadcast.
    y = jnp.dot(x_ref[...], w_ref[...], preferred_element_type=jnp.float32)
    y = y + b_ref[...].astype(jnp.float32)
    o_ref[...] = y.astype(o_ref.dtype)


def _linear_dropout_kernel(x_ref, w_ref, b_ref, bits_ref, o_ref, *,
                           keep_threshold, inv_keep_prob):
    y = jnp.dot(x_ref[...], w_ref[...], preferred_element_type=jnp.float32)
    y = y + b_ref[...].astype(jnp.float32)
    # Inverted dropout: integer threshold + select (bits are uniform in
    # [0, 2^24); keep iff bits >= p * 2^24).
    keep = bits_ref[...] >= keep_threshold
    y = jnp.where(keep, y * inv_keep_prob, 0.0)
    o_ref[...] = y.astype(o_ref.dtype)


def image_branch_forward(x, w, b, *, drop_rate=0.3, training=True,
                         rng_key=None, compute_dtype=jnp.bfloat16,
                         block_m=1024):
    """x: (..., patch_dim), w: (patch_dim, dim), b: (dim,) or (1, dim)."""
    orig_lead = x.shape[:-1]
    patch_dim = x.shape[-1]
    dim = w.shape[-1]

    M = 1
    for s in orig_lead:
        M *= int(s)

    x2 = x.reshape(M, patch_dim).astype(compute_dtype)
    w_c = w.astype(compute_dtype)
    b2 = b.reshape(1, dim).astype(jnp.float32)

    # Tile M: full block if small, otherwise 1024-row tiles (multiple of 8).
    tm = M if M <= block_m else block_m
    grid = (pl.cdiv(M, tm),)

    x_spec = pl.BlockSpec((tm, patch_dim), lambda i: (i, 0))
    w_spec = pl.BlockSpec((patch_dim, dim), lambda i: (0, 0))   # resident
    b_spec = pl.BlockSpec((1, dim), lambda i: (0, 0))           # resident
    o_spec = pl.BlockSpec((tm, dim), lambda i: (i, 0))

    apply_dropout = training and float(drop_rate) > 0.0

    if apply_dropout:
        if rng_key is None:
            rng_key = jax.random.PRNGKey(0)
        # Uniform integers in [0, 2^24): unique per element, no per-tile
        # reseeding hazard, cheap signed int32 compare in-kernel.
        bits = jax.random.randint(rng_key, (M, dim), 0, 1 << 24,
                                  dtype=jnp.int32)
        keep_threshold = int(round(float(drop_rate) * (1 << 24)))
        inv_keep = float(1.0 / (1.0 - float(drop_rate)))
        kernel = partial(_linear_dropout_kernel,
                         keep_threshold=keep_threshold,
                         inv_keep_prob=inv_keep)
        in_specs = [x_spec, w_spec, b_spec,
                    pl.BlockSpec((tm, dim), lambda i: (i, 0))]
        operands = (x2, w_c, b2, bits)
    else:
        kernel = _linear_kernel
        in_specs = [x_spec, w_spec, b_spec]
        operands = (x2, w_c, b2)

    out = pl.pallas_call(
        kernel,
        out_shape=jax.ShapeDtypeStruct((M, dim), jnp.float32),
        grid_spec=pltpu.PrefetchScalarGridSpec(
            num_scalar_prefetch=0,
            grid=grid,
            in_specs=in_specs,
            out_specs=o_spec,
        ),
        compiler_params=pltpu.CompilerParams(
            dimension_semantics=("parallel",),   # M tiles are independent
            vmem_limit_bytes=32 << 20,           # plenty for 1K-row bf16 tiles
        ),
    )(*operands)

    return out.reshape(*orig_lead, dim)


if __name__ == "__main__":
    # Module defaults: patch_dim=512, dim=64, drop_rate=0.3
    patch_dim, dim = 512, 64
    batch, seq = 2, 8
    drop_rate = 0.3

    key = jax.random.PRNGKey(0)
    kx, kw, kb, kd = jax.random.split(key, 4)

    # Parameter init mimicking torch.nn.Linear default
    # (uniform in [-1/sqrt(fan_in), 1/sqrt(fan_in)]).
    bound = 1.0 / (patch_dim ** 0.5)
    w = jax.random.uniform(kw, (patch_dim, dim), jnp.float32, -bound, bound)
    b = jax.random.uniform(kb, (1, dim), jnp.float32, -bound, bound)
    x = jax.random.normal(kx, (batch, seq, patch_dim), jnp.float32)

    # --- Eval mode (dropout = identity): compare against a pure-JAX reference
    #     that uses the same bf16 input/weight cast as the kernel.
    y_eval = image_branch_forward(x, w, b, drop_rate=drop_rate, training=False)
    y_eval = jax.block_until_ready(y_eval)

    x2 = x.reshape(-1, patch_dim)
    y_ref = (jnp.dot(x2.astype(jnp.bfloat16), w.astype(jnp.bfloat16),
                     preferred_element_type=jnp.float32) + b)
    y_ref = y_ref.reshape(batch, seq, dim)

    assert y_eval.shape == (batch, seq, dim)
    assert jnp.allclose(y_eval, y_ref, atol=2e-2, rtol=2e-2)

    # --- Training mode (dropout active): check shape, finiteness, and that the
    #     kept entries are the eval result scaled by 1/(1-p).
    y_train = image_branch_forward(x, w, b, drop_rate=drop_rate, training=True,
                                   rng_key=kd)
    y_train = jax.block_until_ready(y_train)
    assert y_train.shape == (batch, seq, dim)
    assert bool(jnp.all(jnp.isfinite(y_train)))
    kept = y_train != 0.0
    scale = 1.0 / (1.0 - drop_rate)
    assert bool(jnp.allclose(jnp.where(kept, y_train, 0.0),
                             jnp.where(kept, y_ref * scale, 0.0),
                             atol=2e-2, rtol=2e-2))

    print("KERNEL_OK")
</pallas_src>

<mosaic_0001>
module attributes {stable_mosaic.version = 11 : i64} {
  func.func @_linear_kernel(%arg0: i32, %arg1: memref<16x512xbf16, #tpu.memory_space<vmem>>, %arg2: memref<512x64xbf16, #tpu.memory_space<vmem>>, %arg3: memref<1x64xf32, #tpu.memory_space<vmem>>, %arg4: memref<16x64xf32, #tpu.memory_space<vmem>>) attributes {dimension_semantics = [#tpu.dimension_semantics<parallel>], iteration_bounds = array<i64: 1>, scalar_prefetch = 0 : i64, scratch_operands = 0 : i64, tpu.core_type = #tpu.core_type<tc>, window_params = [{transform_indices = @transform_0, window_bounds = array<i64: 16, 512>}, {pipeline_mode = #tpu.pipeline_mode<synchronous>, transform_indices = @transform_1, window_bounds = array<i64: 512, 64>}, {pipeline_mode = #tpu.pipeline_mode<synchronous>, transform_indices = @transform_2, window_bounds = array<i64: 1, 64>}, {transform_indices = @transform_3, window_bounds = array<i64: 16, 64>}]} {
    %c0 = arith.constant 0 : index
    %c0_0 = arith.constant 0 : index
    %0 = vector.load %arg1[%c0, %c0_0] : memref<16x512xbf16, #tpu.memory_space<vmem>>, vector<16x512xbf16>
    %c0_1 = arith.constant 0 : index
    %c0_2 = arith.constant 0 : index
    %1 = vector.load %arg2[%c0_1, %c0_2] : memref<512x64xbf16, #tpu.memory_space<vmem>>, vector<512x64xbf16>
    %cst = arith.constant dense<0.000000e+00> : vector<16x64xf32>
    %2 = tpu.matmul %0, %1, %cst {dimension_numbers = #tpu.dot_dimension_numbers<[1], [0], [0], [1], [0, 0, 1, 1], [], []>} : vector<16x512xbf16>, vector<512x64xbf16>, vector<16x64xf32> -> vector<16x64xf32>
    %c0_3 = arith.constant 0 : index
    %c0_4 = arith.constant 0 : index
    %3 = vector.load %arg3[%c0_3, %c0_4] : memref<1x64xf32, #tpu.memory_space<vmem>>, vector<1x64xf32>
    %4 = vector.broadcast %3 : vector<1x64xf32> to vector<16x64xf32>
    %5 = arith.addf %2, %4 : vector<16x64xf32>
    %c0_5 = arith.constant 0 : index
    %c0_6 = arith.constant 0 : index
    %6 = vector.load %arg4[%c0_5, %c0_6] : memref<16x64xf32, #tpu.memory_space<vmem>>, vector<16x64xf32>
    tpu.vector_store %arg4[%c0_5, %c0_6], %5 {strides = array<i32>} : memref<16x64xf32, #tpu.memory_space<vmem>>, vector<16x64xf32>,
    return
  }
  func.func @transform_0(%arg0: i32) -> (i32, i32) {
    %c0_i32 = arith.constant 0 : i32
    %c0_i32_0 = arith.constant 0 : i32
    return %arg0, %c0_i32 : i32, i32
  }
  func.func @transform_1(%arg0: i32) -> (i32, i32) {
    %c0_i32 = arith.constant 0 : i32
    %c0_i32_0 = arith.constant 0 : i32
    %c0_i32_1 = arith.constant 0 : i32
    return %c0_i32, %c0_i32_0 : i32, i32
  }
  func.func @transform_2(%arg0: i32) -> (i32, i32) {
    %c0_i32 = arith.constant 0 : i32
    %c0_i32_0 = arith.constant 0 : i32
    %c0_i32_1 = arith.constant 0 : i32
    return %c0_i32, %c0_i32_0 : i32, i32
  }
  func.func @transform_3(%arg0: i32) -> (i32, i32) {
    %c0_i32 = arith.constant 0 : i32
    %c0_i32_0 = arith.constant 0 : i32
    return %arg0, %c0_i32 : i32, i32
  }
}

</mosaic_0001>

<bundles_post_ra>
// kernel: tpu_custom_call.1
= control target key start
LH: loop header
LB: loop body
LE: loop exit
PB: predicated region body
PF: predicated region fallthrough
CT: control target
= control target key end

     0   :  { %s685_s0 = inlined_call_operand.vmem [shape: bf16[16,512], index: 0, kind: input, shape index: {}]   ;;  %s686_s1 = inlined_call_operand.vmem [shape: bf16[512,64], index: 1, kind: input, shape index: {}]   ;;  %s687_s2 = inlined_call_operand.vmem [shape: f32[1,64], index: 2, kind: input, shape index: {}]   ;;  %s688_s3 = inlined_call_operand.hbm [shape: f32[16,64], index: 3, kind: output, shape index: {}]  }
   0x1   :  { %v488_v0 = vld [vmem:[%s686_s1 + $0x78] sm:$0xff]   ;;  %v492_v4 = vld [vmem:[%s686_s1 + $0x70] sm:$0xff]   ;;  %v496_v8 = vld [vmem:[%s686_s1 + $0x68] sm:$0xff]  }
   0x2   :  { %v489_v1 = vld [vmem:[%s686_s1 + $0xf8] sm:$0xff]   ;;  %441 = vmatprep.subr.bf16.mxu0 %v488_v0  ;;  %v493_v5 = vld [vmem:[%s686_s1 + $0xf0] sm:$0xff]   ;;  %v497_v9 = vld [vmem:[%s686_s1 + $0xe8] sm:$0xff]  }
   0x3   :  { %v490_v2 = vld [vmem:[%s686_s1 + $0x38] sm:$0xff]   ;;  %463 = vmatprep.subr.bf16.mxu1 %v489_v1  ;;  %v494_v6 = vld [vmem:[%s686_s1 + $0x30] sm:$0xff]   ;;  %v498_v10 = vld [vmem:[%s686_s1 + $0x28] sm:$0xff]  }
   0x4   :  { %v491_v3 = vld [vmem:[%s686_s1 + $0xb8] sm:$0xff]   ;;  %442 = vmatpush3.bf16.msra.mxu0 %v490_v2  ;;  %v495_v7 = vld [vmem:[%s686_s1 + $0xb0] sm:$0xff]   ;;  %v499_v11 = vld [vmem:[%s686_s1 + $0xa8] sm:$0xff]  }
   0x5   :  { %464 = vmatpush3.bf16.msra.mxu1 %v491_v3  ;;  %443 = vmatprep.subr.bf16.mxu0 %v492_v4  ;;  %v500_v12 = vld [vmem:[%s686_s1 + $0x60] sm:$0xff]   ;;  %v504_v16 = vld [vmem:[%s686_s1 + $0x58] sm:$0xff]   ;;  %v508_v20 = vld [vmem:[%s686_s1 + $0x50] sm:$0xff]  }
   0x6   :  { %465 = vmatprep.subr.bf16.mxu1 %v493_v5  ;;  %v501_v13 = vld [vmem:[%s686_s1 + $0xe0] sm:$0xff]   ;;  %v505_v17 = vld [vmem:[%s686_s1 + $0xd8] sm:$0xff]   ;;  %v509_v21 = vld [vmem:[%s686_s1 + $0xd0] sm:$0xff]  }
   0x7   :  { %v502_v14 = vld [vmem:[%s686_s1 + $0x20] sm:$0xff]   ;;  %v506_v18 = vld [vmem:[%s686_s1 + $0x18] sm:$0xff]   ;;  %v510_v22 = vld [vmem:[%s686_s1 + $0x10] sm:$0xff]  }
   0x8   :  { %444 = vmatpush3.bf16.msra.mxu0 %v494_v6  ;;  %v503_v15 = vld [vmem:[%s686_s1 + $0xa0] sm:$0xff]   ;;  %v507_v19 = vld [vmem:[%s686_s1 + $0x98] sm:$0xff]   ;;  %v511_v23 = vld [vmem:[%s686_s1 + $0x90] sm:$0xff]  }
   0x9   :  { %466 = vmatpush3.bf16.msra.mxu1 %v495_v7  ;;  %445 = vmatprep.subr.bf16.mxu0 %v496_v8  ;;  %v512_v24 = vld [vmem:[%s686_s1 + $0x48] sm:$0xff]   ;;  %v516_v28 = vld [vmem:[%s686_s1 + $0x40] sm:$0xff]  }
   0xa   :  { %467 = vmatprep.subr.bf16.mxu1 %v497_v9  ;;  %v513_v25 = vld [vmem:[%s686_s1 + $0xc8] sm:$0xff]   ;;  %v517_v29 = vld [vmem:[%s686_s1 + $0xc0] sm:$0xff]  }
   0xb   :  { %v514_v26 = vld [vmem:[%s686_s1 + $0x8] sm:$0xff]   ;;  %v518_v30 = vld [vmem:[%s686_s1] sm:$0xff]  }
   0xc   :  { %446 = vmatpush3.bf16.msra.mxu0 %v498_v10  ;;  %v515_v27 = vld [vmem:[%s686_s1 + $0x88] sm:$0xff]   ;;  %v519_v31 = vld [vmem:[%s686_s1 + $0x80] sm:$0xff]  }
   0xd   :  { %468 = vmatpush3.bf16.msra.mxu1 %v499_v11  ;;  %447 = vmatprep.subr.bf16.mxu0 %v500_v12  ;;  %v520_v32 = vld [vmem:[%s685_s0] ss:$16 sps:$4 sm:$0xff]   ;;  %v522_v33 = vld [vmem:[%s685_s0 + $0x4] ss:$16 sps:$4 sm:$0xff]   ;;  %v523_v34 = vld [vmem:[%s685_s0 + $0x8] ss:$16 sps:$4 sm:$0xff]  }
   0xe   :  { %469 = vmatprep.subr.bf16.mxu1 %v501_v13  ;;  %v525_v35 = vld [vmem:[%s685_s0 + $0xc] ss:$16 sps:$4 sm:$0xff]  }
  0x10   :  { %448 = vmatpush3.bf16.msra.mxu0 %v502_v14 }
  0x11   :  { %470 = vmatpush3.bf16.msra.mxu1 %v503_v15  ;;  %449 = vmatprep.subr.bf16.mxu0 %v504_v16 }
  0x12   :  { %471 = vmatprep.subr.bf16.mxu1 %v505_v17 }
  0x14   :  { %450 = vmatpush3.bf16.msra.mxu0 %v506_v18 }
  0x15   :  { %472 = vmatpush3.bf16.msra.mxu1 %v507_v19  ;;  %451 = vmatprep.subr.bf16.mxu0 %v508_v20 }
  0x16   :  { %473 = vmatprep.subr.bf16.mxu1 %v509_v21 }
  0x18   :  { %452 = vmatpush3.bf16.msra.mxu0 %v510_v22 }
  0x19   :  { %474 = vmatpush3.bf16.msra.mxu1 %v511_v23  ;;  %453 = vmatprep.subr.bf16.mxu0 %v512_v24 }
  0x1a   :  { %475 = vmatprep.subr.bf16.mxu1 %v513_v25 }
  0x1c   :  { %454 = vmatpush3.bf16.msra.mxu0 %v514_v26 }
  0x1d   :  { %476 = vmatpush3.bf16.msra.mxu1 %v515_v27  ;;  %455 = vmatprep.subr.bf16.mxu0 %v516_v28 }
  0x1e   :  { %477 = vmatprep.subr.bf16.mxu1 %v517_v29 }
  0x20   :  { %456 = vmatpush3.bf16.msra.mxu0 %v518_v30 }
  0x21   :  { %478 = vmatpush3.bf16.msra.mxu1 %v519_v31 }
  0x22   :  { %8 = vsyncpa [#allocation3], 0  ;;  %335 = vmatprep.mubr.bf16.mxu0 %v522_v33  ;;  %376 = vmatprep.mubr.bf16.mxu1 %v525_v35  ;;  %v404_v38 = vld [vmem:[%s687_s2] ss:$0 sm:$0xff]  ;;  %vm385_vm0 = vcmask 523264   ;;  %s548_s0 = smov [#allocation2]  }
  0x23   :  { %336 = vmatmul.mubr.bf16.vlgmr.msra.gmra.mxu0 %v520_v32  ;;  %s393_s4 = sshll.u32 %s548_s0, 4  ;;  %s394_s4 = int_to_ptr.vmem [resolvable:$true] %s393_s4 }
  0x24   :  { %377 = vmatmul.mubr.bf16.vlgmr.msra.gmra.mxu1 %v523_v34  ;;  %s526_s2 = scalar_lea.vmem %s394_s4, 256  ;;  %p531_p1 = scmp.lt.s32.totalorder %s394_s4, %s394_s4 }
  0x25   :  { %p527_p0 = scmp.ne.s32.totalorder %s394_s4, %s526_s2  ;;  %p532_p2 = scmp.lt.s32.totalorder %s526_s2, %s526_s2 }
  0x27   :  { %p533_p3 = por %p532_p2, %p531_p1 }
  0x29   :  { %p534_p4 = pnand %p533_p3, %p527_p0 }
  0xe3   :  { %v457_v36 = vpop.f32.mrf.mxu0 }
  0xe4   :  { %v479_v37 = vpop.f32.mrf.mxu1 }
  0xe5   :  { %v458_v39 = vpop.f32.mrf.mxu0 }
  0xe6   :  { %v459_v40 = vadd.f32 %v458_v39, %v457_v36  ;;  %v480_v41 = vpop.f32.mrf.mxu1 }
  0xe7   :  { %v460_v42 = vpop.f32.mrf.mxu0  ;;  %v481_v44 = vadd.f32 %v480_v41, %v479_v37 }
  0xe8   :  { %v338_v43 = vadd.f32 %v459_v40, %v404_v38  ;;  %v482_v45 = vpop.f32.mrf.mxu1 }
  0xe9   :  { %v461_v46 = vpop.f32.mrf.mxu0 }
  0xea   :  { %v379_v47 = vadd.f32 %v481_v44, %v338_v43  ;;  %v462_v48 = vadd.f32 %v461_v46, %v460_v42  ;;  %v483_v49 = vpop.f32.mrf.mxu1 }
  0xeb   :  { %v484_v51 = vadd.f32 %v483_v49, %v482_v45 }
  0xec   :  { %386 = vst.msk [vmem:[#allocation2] sm:$0xff] %vm385_vm0, %v379_v47  ;;  %v341_v50 = vadd.f32 %v462_v48, %v404_v38 }
  0xee   :  { %v382_v52 = vadd.f32 %v484_v51, %v341_v50 }
  0xf0   :  { %387 = vst.msk [vmem:[#allocation2 + $0x8] sm:$0xff] %vm385_vm0, %v382_v52 }
  0xf1   :  { %537 = shalt.err (!%p534_p4)
}
  0xf2   :  { %s549_s5 = smov 128   ;;  %s550_s6 = smov 8  }
  0xf3   :  { %399 = dma.vmem_to_hbm [thread:$0]  %s394_s4, 256, %s688_s3, [#allocation3], %s549_s5, %s549_s5, %s550_s6  }
  0xf4   :  { %546 = dma.done.wait [#allocation3], 256  }
  0xf5   :  { %547 = vsyncadd [#allocation3], 4294967040 }
  0xf6   :  { %403 = vsyncpa [#allocation3], 1 }

</bundles_post_ra>
